<compile_context>
chip_gen: v7x
topology: tpu7x:2x2x1
jax: 0.10.0
libtpu: 0.0.40
codegen_flags: <defaults>
</compile_context>

<pallas_src>
import math

import numpy as np
import jax
import jax.numpy as jnp
from jax.experimental import pallas as pl
from jax.experimental.pallas import tpu as pltpu


# ---------------------------------------------------------------------------
# Problem sizes (small, consistent with the module's forward).
# ---------------------------------------------------------------------------
E = 8          # embed_dim
H = 4          # num_heads
HD = E // H    # head_dim = 2
LQ = 5         # query sequence length
LK = 10        # key / value sequence length
N = 2          # batch size

NE = N * E         # 16  : lane width of activations (batch folded into lanes)
NBLK = N * H       # 8   : number of independent softmax blocks
SW = NBLK * LK     # 80  : lane width of the fused score matrix

# ---------------------------------------------------------------------------
# Constant-slab row layout (all section starts are multiples of 8 sublanes,
# all sections start at lane 0 -> aligned, cheap static loads in the kernel).
# ---------------------------------------------------------------------------
R_WQ = 0        # (NE, NE)  pre-transposed, scaled, batch-block-diag Wq
R_WK = 16       # (NE, NE)  batch-block-diag Wk (NOT transposed: used as Wk @ x2T)
R_WV = 32       # (NE, NE)  pre-transposed batch-block-diag Wv
R_WO = 48       # (NE, NE)  pre-transposed batch-block-diag Wo
R_BQ = 64       # (1, NE)   scaled, batch-tiled bq
R_BV = 72       # (1, NE)   batch-tiled bv
R_BO = 80       # (1, NE)   batch-tiled bo
R_BK = 88       # (NE, 1)   batch-tiled bk as a column (broadcast over key lanes)
R_KMASK = 104   # (NE, SW)  block-diag mask for the fused key matrix
R_BB = 120      # (SW, SW)  same-softmax-block indicator (per-block sum via one matmul)
R_RSELT = 200   # (LK, SW)  lane-replication selector: out[:, j] = in[:, j % LK]
R_VMASK = 216   # (SW, NE)  block-diag mask for the fused value matrix
R_RSEL = 296    # (SW, LK)  sublane-replication selector: out[j, :] = in[j % LK, :]
ROWS = 376      # total slab rows  (376 x 80 f32 ~= 118 KB)


def _mha_kernel(x1_ref, x2_ref, x2t_ref, c_ref, o_ref):
    """Fully fused MHA for all batch elements and heads, single invocation.

    x1_ref : (LQ, N*E)  queries, lane index = n*E + e (free reshape of (LQ, N, E))
    x2_ref : (LK, N*E)  key/value source, same lane layout
    x2t_ref: (N*E, LK)  key/value source pre-transposed (embedding on sublanes)
    c_ref  : (ROWS, SW) packed constants (weights, biases, masks, selectors)
    o_ref  : (LQ, N*E)  output, lane index = n*E + e
    """
    f32 = jnp.float32
    x1 = x1_ref[...]
    x2 = x2_ref[...]
    x2t = x2t_ref[...]

    wq = c_ref[pl.ds(R_WQ, NE), pl.ds(0, NE)]
    wk = c_ref[pl.ds(R_WK, NE), pl.ds(0, NE)]
    wv = c_ref[pl.ds(R_WV, NE), pl.ds(0, NE)]
    wo = c_ref[pl.ds(R_WO, NE), pl.ds(0, NE)]
    bq = c_ref[pl.ds(R_BQ, 1), pl.ds(0, NE)]
    bv = c_ref[pl.ds(R_BV, 1), pl.ds(0, NE)]
    bo = c_ref[pl.ds(R_BO, 1), pl.ds(0, NE)]
    bk = c_ref[pl.ds(R_BK, NE), pl.ds(0, 1)]
    kmask = c_ref[pl.ds(R_KMASK, NE), pl.ds(0, SW)]
    bb = c_ref[pl.ds(R_BB, SW), pl.ds(0, SW)]
    rselt = c_ref[pl.ds(R_RSELT, LK), pl.ds(0, SW)]
    vmask = c_ref[pl.ds(R_VMASK, SW), pl.ds(0, NE)]
    rsel = c_ref[pl.ds(R_RSEL, SW), pl.ds(0, LK)]

    # --- input projections (both batch elements at once; scale pre-folded into wq/bq) ----
    q = jnp.dot(x1, wq, preferred_element_type=f32) + bq           # (LQ, 16), pre-scaled
    kt = jnp.dot(wk, x2t, preferred_element_type=f32) + bk         # (16, LK), emb on sublanes
    v = jnp.dot(x2, wv, preferred_element_type=f32) + bv           # (LK, 16)

    # --- all (batch, head) scores with ONE matmul -----------------------------------------
    # kbig[c, j] = kt[c, j % LK] iff c // HD == j // LK (block-diagonal), else 0.
    kbig = jnp.dot(kt, rselt, preferred_element_type=f32) * kmask  # (16, 80)
    s = jnp.dot(q, kbig, preferred_element_type=f32)               # (LQ, 80)

    # Per-(batch, head) softmax over each LK-lane block.  Subtracting the per-row global max
    # is exact (it cancels inside every block).  The approximate reciprocal means the block
    # probabilities sum to 1 only to ~1e-3 (documented, matches the test tolerance).
    s_max = jnp.max(s, axis=-1, keepdims=True)
    ex = jnp.exp(s - s_max)
    denom = jnp.dot(ex, bb, preferred_element_type=f32)            # per-block sums, (LQ, 80)
    denom = jnp.maximum(denom, 1e-30)                              # guard (never hit here)
    p = ex * pl.reciprocal(denom, approx=True)

    # --- attention-weighted values, all heads/batches with ONE matmul ---------------------
    # vbig[j, c] = v[j % LK, c] iff j // LK == c // HD, else 0.
    vbig = jnp.dot(rsel, v, preferred_element_type=f32) * vmask    # (80, 16)
    attn = jnp.dot(p, vbig, preferred_element_type=f32)            # (LQ, 16): heads in place

    # --- output projection (both batches at once) -----------------------------------------
    out = jnp.dot(attn, wo, preferred_element_type=f32) + bo       # (LQ, 16)
    o_ref[...] = out.astype(o_ref.dtype)


# ---------------------------------------------------------------------------
# One-time (init-time) constant packing -- pure NumPy, no per-call work.
# ---------------------------------------------------------------------------
def _block_diag2_np(m):
    """blockdiag(m, m) for the 2-element batch folded into the lane axis."""
    r, c = m.shape
    out = np.zeros((N * r, N * c), np.float32)
    out[:r, :c] = m
    out[r:, c:] = m
    return out


def pack_constants(params):
    """Pre-transpose, scale-fold, batch-expand and pack all parameters + masks (once)."""
    wq, wk, wv, wo, bq, bk, bv, bo = [np.asarray(p, np.float32) for p in params]
    scale = 1.0 / math.sqrt(HD)

    slab = np.zeros((ROWS, SW), np.float32)
    slab[R_WQ:R_WQ + NE, :NE] = _block_diag2_np(wq.T) * scale
    slab[R_WK:R_WK + NE, :NE] = _block_diag2_np(wk)          # used as Wk_blk @ x2T
    slab[R_WV:R_WV + NE, :NE] = _block_diag2_np(wv.T)
    slab[R_WO:R_WO + NE, :NE] = _block_diag2_np(wo.T)
    slab[R_BQ, :NE] = np.tile(bq[0], N) * scale
    slab[R_BV, :NE] = np.tile(bv[0], N)
    slab[R_BO, :NE] = np.tile(bo[0], N)
    slab[R_BK:R_BK + NE, 0] = np.tile(bk[0], N)

    c = np.arange(NE)
    j = np.arange(SW)
    kk = np.arange(LK)
    slab[R_KMASK:R_KMASK + NE, :SW] = ((c[:, None] // HD) == (j[None, :] // LK))
    slab[R_BB:R_BB + SW, :SW] = ((j[:, None] // LK) == (j[None, :] // LK))
    slab[R_RSELT:R_RSELT + LK, :SW] = (kk[:, None] == (j[None, :] % LK))
    slab[R_VMASK:R_VMASK + SW, :NE] = ((j[:, None] // LK) == (c[None, :] // HD))
    slab[R_RSEL:R_RSEL + SW, :LK] = ((j[:, None] % LK) == kk[None, :])
    return jnp.asarray(slab)


# ---------------------------------------------------------------------------
# Wrapper.
# ---------------------------------------------------------------------------
def mha_pallas(x1_lne, x2_lne, const_slab):
    """x1_lne: (LQ, N, E), x2_lne: (LK, N, E) (torch seq-first layout).

    Returns the attention output in the same (LQ, N, E) layout.
    """
    # Free (row-major-compatible) reshapes; one tiny transpose for the key path so the
    # kernel never transposes anything (no in-kernel XLU vxpose).
    x1_2d = x1_lne.reshape(LQ, NE)
    x2_2d = x2_lne.reshape(LK, NE)
    x2t = jnp.transpose(x2_lne, (1, 2, 0)).reshape(NE, LK)

    vmem = lambda: pl.BlockSpec(memory_space=pltpu.MemorySpace.VMEM)
    out2d = pl.pallas_call(
        _mha_kernel,
        out_shape=jax.ShapeDtypeStruct((LQ, NE), jnp.float32),
        in_specs=[vmem(), vmem(), vmem(), vmem()],
        out_specs=vmem(),
    )(x1_2d, x2_2d, x2t, const_slab)

    return out2d.reshape(LQ, N, E)


mha_pallas = jax.jit(mha_pallas)


# ---------------------------------------------------------------------------
# Pure-JAX reference (mirrors torch.nn.MultiheadAttention forward).
# ---------------------------------------------------------------------------
def mha_reference(x1_lne, x2_lne, params):
    wq, wk, wv, wo, bq, bk, bv, bo = params
    x1 = jnp.transpose(x1_lne, (1, 0, 2))   # (N, LQ, E)
    x2 = jnp.transpose(x2_lne, (1, 0, 2))   # (N, LK, E)

    q = x1 @ wq.T + bq[0]
    k = x2 @ wk.T + bk[0]
    v = x2 @ wv.T + bv[0]

    qh = q.reshape(N, LQ, H, HD).transpose(0, 2, 1, 3)
    kh = k.reshape(N, LK, H, HD).transpose(0, 2, 1, 3)
    vh = v.reshape(N, LK, H, HD).transpose(0, 2, 1, 3)

    s = jnp.einsum('nhqd,nhkd->nhqk', qh, kh) / math.sqrt(HD)
    p = jax.nn.softmax(s, axis=-1)
    o = jnp.einsum('nhqk,nhkd->nhqd', p, vh)
    o = o.transpose(0, 2, 1, 3).reshape(N, LQ, E)
    o = o @ wo.T + bo[0]
    return jnp.transpose(o, (1, 0, 2))      # (LQ, N, E)


def make_params(key):
    """Deterministic parameter init (xavier-ish uniform like torch's MHA)."""
    ks = jax.random.split(key, 5)
    bound = 1.0 / math.sqrt(E)
    in_proj_w = jax.random.uniform(ks[0], (3 * E, E), jnp.float32, -bound, bound)
    wq, wk, wv = in_proj_w[:E], in_proj_w[E:2 * E], in_proj_w[2 * E:]
    wo = jax.random.uniform(ks[1], (E, E), jnp.float32, -bound, bound)
    bq = jax.random.uniform(ks[2], (1, E), jnp.float32, -bound, bound)
    bk = jnp.zeros((1, E), jnp.float32)   # torch inits in_proj bias to 0; keep bq nonzero for coverage
    bv = jnp.zeros((1, E), jnp.float32)
    bo = jax.random.uniform(ks[3], (1, E), jnp.float32, -bound, bound)
    return (wq, wk, wv, wo, bq, bk, bv, bo)


if __name__ == "__main__":
    key = jax.random.PRNGKey(0)
    k1, k2, kp = jax.random.split(key, 3)

    # torch default layout: (seq_len, batch, embed)
    x1 = jax.random.normal(k1, (LQ, N, E), jnp.float32)   # query
    x2 = jax.random.normal(k2, (LK, N, E), jnp.float32)   # key / value

    params = make_params(kp)
    const_slab = pack_constants(params)   # hoisted: packed once at init, reused every call

    out = mha_pallas(x1, x2, const_slab)
    out = jax.block_until_ready(out)

    ref = mha_reference(x1, x2, params)
    assert out.shape == (LQ, N, E), out.shape
    # Tolerance accounts for the approximate (EUP) reciprocal in the softmax denominator.
    assert jnp.allclose(out, ref, atol=1e-3, rtol=1e-3), \
        f"max abs err = {jnp.max(jnp.abs(out - ref))}"

    print("KERNEL_OK")
</pallas_src>

<mosaic_0001>
module attributes {stable_mosaic.version = 11 : i64} {
  func.func @_mha_kernel(%arg0: memref<5x16xf32, #tpu.memory_space<vmem>>, %arg1: memref<10x16xf32, #tpu.memory_space<vmem>>, %arg2: memref<16x10xf32, #tpu.memory_space<vmem>>, %arg3: memref<376x80xf32, #tpu.memory_space<vmem>>, %arg4: memref<5x16xf32, #tpu.memory_space<vmem>>) attributes {dimension_semantics = [], scalar_prefetch = 0 : i64, scratch_operands = 0 : i64, tpu.core_type = #tpu.core_type<tc>} {
    %c0 = arith.constant 0 : index
    %c0_0 = arith.constant 0 : index
    %0 = vector.load %arg0[%c0, %c0_0] : memref<5x16xf32, #tpu.memory_space<vmem>>, vector<5x16xf32>
    %c0_1 = arith.constant 0 : index
    %c0_2 = arith.constant 0 : index
    %1 = vector.load %arg1[%c0_1, %c0_2] : memref<10x16xf32, #tpu.memory_space<vmem>>, vector<10x16xf32>
    %c0_3 = arith.constant 0 : index
    %c0_4 = arith.constant 0 : index
    %2 = vector.load %arg2[%c0_3, %c0_4] : memref<16x10xf32, #tpu.memory_space<vmem>>, vector<16x10xf32>
    %c0_5 = arith.constant 0 : index
    %c0_6 = arith.constant 0 : index
    %3 = vector.load %arg3[%c0_5, %c0_6] : memref<376x80xf32, #tpu.memory_space<vmem>>, vector<16x16xf32>
    %c16 = arith.constant 16 : index
    %c0_7 = arith.constant 0 : index
    %4 = vector.load %arg3[%c16, %c0_7] : memref<376x80xf32, #tpu.memory_space<vmem>>, vector<16x16xf32>
    %c32 = arith.constant 32 : index
    %c0_8 = arith.constant 0 : index
    %5 = vector.load %arg3[%c32, %c0_8] : memref<376x80xf32, #tpu.memory_space<vmem>>, vector<16x16xf32>
    %c48 = arith.constant 48 : index
    %c0_9 = arith.constant 0 : index
    %6 = vector.load %arg3[%c48, %c0_9] : memref<376x80xf32, #tpu.memory_space<vmem>>, vector<16x16xf32>
    %c64 = arith.constant 64 : index
    %c0_10 = arith.constant 0 : index
    %7 = vector.load %arg3[%c64, %c0_10] : memref<376x80xf32, #tpu.memory_space<vmem>>, vector<1x16xf32>
    %c72 = arith.constant 72 : index
    %c0_11 = arith.constant 0 : index
    %8 = vector.load %arg3[%c72, %c0_11] : memref<376x80xf32, #tpu.memory_space<vmem>>, vector<1x16xf32>
    %c80 = arith.constant 80 : index
    %c0_12 = arith.constant 0 : index
    %9 = vector.load %arg3[%c80, %c0_12] : memref<376x80xf32, #tpu.memory_space<vmem>>, vector<1x16xf32>
    %c88 = arith.constant 88 : index
    %c0_13 = arith.constant 0 : index
    %10 = vector.load %arg3[%c88, %c0_13] : memref<376x80xf32, #tpu.memory_space<vmem>>, vector<16x1xf32>
    %c104 = arith.constant 104 : index
    %c0_14 = arith.constant 0 : index
    %11 = vector.load %arg3[%c104, %c0_14] : memref<376x80xf32, #tpu.memory_space<vmem>>, vector<16x80xf32>
    %c120 = arith.constant 120 : index
    %c0_15 = arith.constant 0 : index
    %12 = vector.load %arg3[%c120, %c0_15] : memref<376x80xf32, #tpu.memory_space<vmem>>, vector<80x80xf32>
    %c200 = arith.constant 200 : index
    %c0_16 = arith.constant 0 : index
    %13 = vector.load %arg3[%c200, %c0_16] : memref<376x80xf32, #tpu.memory_space<vmem>>, vector<10x80xf32>
    %c216 = arith.constant 216 : index
    %c0_17 = arith.constant 0 : index
    %14 = vector.load %arg3[%c216, %c0_17] : memref<376x80xf32, #tpu.memory_space<vmem>>, vector<80x16xf32>
    %c296 = arith.constant 296 : index
    %c0_18 = arith.constant 0 : index
    %15 = vector.load %arg3[%c296, %c0_18] : memref<376x80xf32, #tpu.memory_space<vmem>>, vector<80x10xf32>
    %cst = arith.constant dense<0.000000e+00> : vector<5x16xf32>
    %16 = tpu.matmul %0, %3, %cst {dimension_numbers = #tpu.dot_dimension_numbers<[1], [0], [0], [1], [0, 0, 1, 1], [], []>} : vector<5x16xf32>, vector<16x16xf32>, vector<5x16xf32> -> vector<5x16xf32>
    %17 = vector.broadcast %7 : vector<1x16xf32> to vector<5x16xf32>
    %18 = arith.addf %16, %17 : vector<5x16xf32>
    %cst_19 = arith.constant dense<0.000000e+00> : vector<16x10xf32>
    %19 = tpu.matmul %4, %2, %cst_19 {dimension_numbers = #tpu.dot_dimension_numbers<[1], [0], [0], [1], [0, 0, 1, 1], [], []>} : vector<16x16xf32>, vector<16x10xf32>, vector<16x10xf32> -> vector<16x10xf32>
    %20 = vector.broadcast %10 : vector<16x1xf32> to vector<16x10xf32>
    %21 = arith.addf %19, %20 : vector<16x10xf32>
    %cst_20 = arith.constant dense<0.000000e+00> : vector<10x16xf32>
    %22 = tpu.matmul %1, %5, %cst_20 {dimension_numbers = #tpu.dot_dimension_numbers<[1], [0], [0], [1], [0, 0, 1, 1], [], []>} : vector<10x16xf32>, vector<16x16xf32>, vector<10x16xf32> -> vector<10x16xf32>
    %23 = vector.broadcast %8 : vector<1x16xf32> to vector<10x16xf32>
    %24 = arith.addf %22, %23 : vector<10x16xf32>
    %cst_21 = arith.constant dense<0.000000e+00> : vector<16x80xf32>
    %25 = tpu.matmul %21, %13, %cst_21 {dimension_numbers = #tpu.dot_dimension_numbers<[1], [0], [0], [1], [0, 0, 1, 1], [], []>} : vector<16x10xf32>, vector<10x80xf32>, vector<16x80xf32> -> vector<16x80xf32>
    %26 = arith.mulf %25, %11 : vector<16x80xf32>
    %cst_22 = arith.constant dense<0.000000e+00> : vector<5x80xf32>
    %27 = tpu.matmul %18, %26, %cst_22 {dimension_numbers = #tpu.dot_dimension_numbers<[1], [0], [0], [1], [0, 0, 1, 1], [], []>} : vector<5x16xf32>, vector<16x80xf32>, vector<5x80xf32> -> vector<5x80xf32>
    %cst_23 = arith.constant dense<0xFF800000> : vector<5xf32>
    %28 = vector.multi_reduction <maximumf>, %27, %cst_23 [1] : vector<5x80xf32> to vector<5xf32>
    %29 = vector.shape_cast %28 : vector<5xf32> to vector<5x1xf32>
    %30 = vector.broadcast %29 : vector<5x1xf32> to vector<5x80xf32>
    %31 = arith.subf %27, %30 : vector<5x80xf32>
    %32 = math.exp %31 : vector<5x80xf32>
    %cst_24 = arith.constant dense<0.000000e+00> : vector<5x80xf32>
    %33 = tpu.matmul %32, %12, %cst_24 {dimension_numbers = #tpu.dot_dimension_numbers<[1], [0], [0], [1], [0, 0, 1, 1], [], []>} : vector<5x80xf32>, vector<80x80xf32>, vector<5x80xf32> -> vector<5x80xf32>
    %cst_25 = arith.constant 1.000000e-30 : f32
    %34 = vector.broadcast %cst_25 : f32 to vector<5x80xf32>
    %35 = arith.maximumf %33, %34 : vector<5x80xf32>
    %36 = tpu.reciprocal %35 {approx = true} : vector<5x80xf32> -> vector<5x80xf32>
    %37 = arith.mulf %32, %36 : vector<5x80xf32>
    %cst_26 = arith.constant dense<0.000000e+00> : vector<80x16xf32>
    %38 = tpu.matmul %15, %24, %cst_26 {dimension_numbers = #tpu.dot_dimension_numbers<[1], [0], [0], [1], [0, 0, 1, 1], [], []>} : vector<80x10xf32>, vector<10x16xf32>, vector<80x16xf32> -> vector<80x16xf32>
    %39 = arith.mulf %38, %14 : vector<80x16xf32>
    %cst_27 = arith.constant dense<0.000000e+00> : vector<5x16xf32>
    %40 = tpu.matmul %37, %39, %cst_27 {dimension_numbers = #tpu.dot_dimension_numbers<[1], [0], [0], [1], [0, 0, 1, 1], [], []>} : vector<5x80xf32>, vector<80x16xf32>, vector<5x16xf32> -> vector<5x16xf32>
    %cst_28 = arith.constant dense<0.000000e+00> : vector<5x16xf32>
    %41 = tpu.matmul %40, %6, %cst_28 {dimension_numbers = #tpu.dot_dimension_numbers<[1], [0], [0], [1], [0, 0, 1, 1], [], []>} : vector<5x16xf32>, vector<16x16xf32>, vector<5x16xf32> -> vector<5x16xf32>
    %42 = vector.broadcast %9 : vector<1x16xf32> to vector<5x16xf32>
    %43 = arith.addf %41, %42 : vector<5x16xf32>
    %c0_29 = arith.constant 0 : index
    %c0_30 = arith.constant 0 : index
    %44 = vector.load %arg4[%c0_29, %c0_30] : memref<5x16xf32, #tpu.memory_space<vmem>>, vector<5x16xf32>
    tpu.vector_store %arg4[%c0_29, %c0_30], %43 {strides = array<i32>} : memref<5x16xf32, #tpu.memory_space<vmem>>, vector<5x16xf32>,
    return
  }
}

</mosaic_0001>

<bundles_post_ra>
// kernel: mha_pallas.1
= control target key start
LH: loop header
LB: loop body
LE: loop exit
PB: predicated region body
PF: predicated region fallthrough
CT: control target
= control target key end

     0   :  { %vm73_vm0 = vcmask 130048   ;;  %v1139_v3 = vmov 0   ;;  %vm330_vm1 = vcmask 1041408   ;;  %vm1140_vm2 = vmmov 1   ;;  %s1384_s2 = inlined_call_operand.vmem [shape: f32[16,10], index: 2, kind: input, shape index: {}]   ;;  %s1385_s3 = inlined_call_operand.vmem [shape: f32[376,80], index: 3, kind: input, shape index: {}]   ;;  %s1386_s0 = inlined_call_operand.vmem [shape: f32[5,16], index: 0, kind: input, shape index: {}]   ;;  %s1387_s1 = inlined_call_operand.vmem [shape: f32[10,16], index: 1, kind: input, shape index: {}]   ;;  %s1388_s4 = inlined_call_operand.vmem [shape: f32[5,16], index: 4, kind: output, shape index: {}]  }
   0x1   :  { %v20_v0 = vld [vmem:[%s1384_s2] sm:$0xff]  ;;  %v21_v1 = vld [vmem:[%s1384_s2 + $0x8] sm:$0xff]  ;;  %v24_v2 = vld [vmem:[%s1385_s3 + $0x10] sm:$0xff]  ;;  %1134 = vset.pattern.permute.xlu0 %v1139_v3  ;;  %v1141_v17 = vmov 0.0|0.0   ;;  %vm1142_vm4 = vmmov 0   ;;  %v1143_v18 = vmov 0.0  }
   0x2   :  { %v1073_v4 = vpack.c.bf16 %v21_v1, %v20_v0  ;;  %974 = vmatprep.mubr.msk.f32.mxu1 %vm73_vm0, %v24_v2  ;;  %v33_v5 = vld [vmem:[%s1385_s3 + $0x58] sm:$0xff]  ;;  %v34_v6 = vld [vmem:[%s1385_s3 + $0x60] sm:$0xff]  ;;  %v47_v8 = vld [vmem:[%s1385_s3 + $0xc8] sm:$0xff]  ;;  %1070 = vmatprep.subr.bf16.mxu0 %v1141_v17  ;;  %vm323_vm5 = vcmask 80896   ;;  %vm484_vm6 = vcmask 651264   ;;  %vm491_vm7 = vcmask 654336  }
   0x3   :  { %149 = vperm.xlu0 %1134, %v33_v5   ;;  %v25_v7 = vld [vmem:[%s1385_s3 + $0x18] sm:$0xff]  ;;  %v48_v9 = vld [vmem:[%s1385_s3 + $0xd0] sm:$0x3]  ;;  %vm1195_vm3 = vmpackc.low %vm330_vm1, %vm1140_vm2  ;;  %967 = vmatprep.mubr.msk.f32.mxu0 %vm1142_vm4, %v1143_v18  ;;  %vm876_vm8 = vcmask 126976  }
   0x4   :  { %1074 = vmatprep.subr.bf16.mxu1 %v1073_v4  ;;  %v1081_v10 = vpack.c.bf16 %v48_v9, %v47_v8  ;;  %v22_v12 = vld [vmem:[%s1385_s3] sm:$0xff]  ;;  %v23_v13 = vld [vmem:[%s1385_s3 + $0x8] sm:$0xff]  ;;  %v36_v31 = vld [vmem:[%s1385_s3 + $0x70] sm:$0xff] }
   0x5   :  { %1076 = vmatpush3.bf16.msra.mxu1 %v1073_v4  ;;  %v1071_v14 = vpack.c.bf16 %v23_v13, %v22_v12  ;;  %v26_v15 = vld [vmem:[%s1385_s3 + $0x20] sm:$0xff]  ;;  %v27_v16 = vld [vmem:[%s1385_s3 + $0x28] sm:$0xff]  ;;  %v37_v46 = vld [vmem:[%s1385_s3 + $0x78] sm:$0xff] }
   0x6   :  { %1083 = vmatprep.subr.msk.bf16.mxu1 %vm1195_vm3, %v1081_v10  ;;  %v1077_v19 = vpack.c.bf16 %v27_v16, %v26_v15  ;;  %v17_v20 = vld [vmem:[%s1386_s0] sm:$0x1f]  ;;  %v19_v28 = vld [vmem:[%s1387_s1 + $0x8] sm:$0x3]  ;;  %v40_v53 = vld [vmem:[%s1385_s3 + $0x90] sm:$0xff] }
   0x7   :  { %154 = vperm.xlu0 %1134, %v34_v6   ;;  %1072 = vmatpush3.bf16.msra.mxu0 %v1071_v14  ;;  %v18_v27 = vld [vmem:[%s1387_s1] sm:$0xff]  ;;  %v35_v32 = vld [vmem:[%s1385_s3 + $0x68] sm:$0xff]  ;;  %v41_v55 = vld [vmem:[%s1385_s3 + $0x98] sm:$0xff] }
   0x8   :  { %975 = vmatmul.mubr.msk.f32.vlgmr.msra.gmra.mrb[0].mxu1 %vm73_vm0, %v25_v7  ;;  %1078 = vmatprep.subr.bf16.mxu0 %v1077_v19  ;;  %v882_v37 = vld [vmem:[%s1385_s3 + $0x40] ss:$0 sm:$0xff]  ;;  %v886_v40 = vld [vmem:[%s1385_s3 + $0x48] ss:$0 sm:$0xff]  ;;  %v60_v59 = vld [vmem:[%s1385_s3 + $0x130] sm:$0xff] }
   0x9   :  { %1086 = vmatpush3.bf16.msk.msra.mxu1 %vm1195_vm3, %v1081_v10  ;;  %v38_v47 = vld [vmem:[%s1385_s3 + $0x80] sm:$0xff]  ;;  %v39_v52 = vld [vmem:[%s1385_s3 + $0x88] sm:$0xff]  ;;  %v44_v61 = vld [vmem:[%s1385_s3 + $0xb0] sm:$0xff] }
   0xa   :  { %1090 = vmatprep.subr.bf16.mxu1 %v1141_v17  ;;  %968 = vmatmul.mubr.msk.f32.vlgmr.msra.gmra.mrb[0].mxu0 %vm73_vm0, %v17_v20  ;;  %v1091_v48 = vpack.c.bf16 %v38_v47, %v37_v46  ;;  %v1094_v54 = vpack.c.bf16 %v40_v53, %v39_v52  ;;  %v42_v56 = vld [vmem:[%s1385_s3 + $0xa0] sm:$0xff]  ;;  %v59_v58 = vld [vmem:[%s1385_s3 + $0x128] sm:$0xff]  ;;  %v61_v63 = vld [vmem:[%s1385_s3 + $0x138] sm:$0xff] }
   0xb   :  { %1080 = vmatpush3.bf16.msra.mxu0 %v1077_v19  ;;  %981 = vmatprep.mubr.msk.f32.mxu0 %vm73_vm0, %v18_v27  ;;  %v1097_v57 = vpack.c.bf16 %v42_v56, %v41_v55  ;;  %v43_v60 = vld [vmem:[%s1385_s3 + $0xa8] sm:$0xff]  ;;  %v45_v0 = vld [vmem:[%s1385_s3 + $0xb8] sm:$0xff]  ;;  %v62_v1 = vld [vmem:[%s1385_s3 + $0x140] sm:$0xff] }
   0xc   :  { %1087 = vmatprep.subr.bf16.mxu0 %v1141_v17  ;;  %v1100_v62 = vpack.c.bf16 %v44_v61, %v43_v60  ;;  %v46_v2 = vld [vmem:[%s1385_s3 + $0xc0] sm:$0xff]  ;;  %v63_v3 = vld [vmem:[%s1385_s3 + $0x148] sm:$0xff]  ;;  %v64_v5 = vld [vmem:[%s1385_s3 + $0x150] sm:$0xff] }
   0xd   :  { %v1103_v4 = vpack.c.bf16 %v46_v2, %v45_v0  ;;  %v65_v6 = vld [vmem:[%s1385_s3 + $0x158] sm:$0xff]  ;;  %v66_v7 = vld [vmem:[%s1385_s3 + $0x160] sm:$0xff]  ;;  %v67_v8 = vld [vmem:[%s1385_s3 + $0x168] sm:$0xff] }
   0xe   :  { %982 = vmatmul.mubr.msk.f32.vlgmr.msra.gmra.mrb[2].mxu0 %vm73_vm0, %v19_v28  ;;  %v68_v9 = vld [vmem:[%s1385_s3 + $0x170] sm:$0xff]  ;;  %v50_v14 = vld [vmem:[%s1385_s3 + $0xe0] sm:$0xff]  ;;  %v49_v15 = vld [vmem:[%s1385_s3 + $0xd8] sm:$0xff] }
   0xf   :  { %995 = vmatprep.mubr.msk.f32.mxu0 %vm1142_vm4, %v1143_v18  ;;  %v54_v28 = vld [vmem:[%s1385_s3 + $0x100] sm:$0xff] }
  0x82   :  { %v150_v21 = vpop.permute.xlu0 %149 }
  0x86   :  { %v155_v24 = vpop.permute.xlu0 %154 }
  0xdb   :  { %v976_v22 = vpop.f32.mrb[0].mxu1 }
  0xdc   :  { %v229_v23 = vpop.f32.mrb[1].mxu1  ;;  %v235_v26 = vadd.f32 %v976_v22, %v155_v24  ;;  %v52_v22 = vld [vmem:[%s1385_s3 + $0xf0] sm:$0xff] }
  0xdd   :  { %v230_v25 = vadd.f32 %v229_v23, %v150_v21  ;;  %v143_v29 = vpop.f32.mrb[0].mxu0 }
  0xde   :  { %v969_v30 = vpop.f32.mrb[1].mxu0  ;;  %v144_v39 = vadd.f32 %v882_v37, %v143_v29  ;;  %v53_v29 = vld [vmem:[%s1385_s3 + $0xf8] sm:$0xff]  ;;  %v56_v37 = vld [vmem:[%s1385_s3 + $0x110] sm:$0xff] }
  0xdf   :  { %988 = vmatprep.mubr.msk.f32.mxu1 %vm323_vm5, %v230_v25 }
  0xe0   :  { %989 = vmatmul.mubr.msk.f32.vlgmr.msra.gmra.mrb[2].mxu1 %vm323_vm5, %v235_v26 }
  0xe1   :  { %1018 = vmatprep.mubr.msk.f32.mxu1 %vm1142_vm4, %v1143_v18  ;;  %v983_v41 = vpop.f32.mrb[2].mxu0  ;;  %1092 = vmatpush3.bf16.msra.mxu1 %v1091_v48 }
  0xe2   :  { %v320_v42 = vadd.f32 %v983_v41, %v886_v40  ;;  %v314_v43 = vpop.f32.mrb[3].mxu0  ;;  %1093 = vmatprep.subr.bf16.mxu1 %v1141_v17 }
  0xe3   :  { %v315_v44 = vadd.f32 %v886_v40, %v314_v43 }
  0xe5   :  { %v1105_v45 = vpack.c.bf16 %v320_v42, %v315_v44  ;;  %1095 = vmatpush3.bf16.msra.mxu1 %v1094_v54  ;;  %v58_v44 = vld [vmem:[%s1385_s3 + $0x120] sm:$0xff] }
  0xe6   :  { %1096 = vmatprep.subr.bf16.mxu1 %v1141_v17 }
  0xe9   :  { %1098 = vmatpush3.bf16.msra.mxu1 %v1097_v57 }
  0xea   :  { %1099 = vmatprep.subr.bf16.mxu1 %v1141_v17 }
  0xed   :  { %1101 = vmatpush3.bf16.msra.mxu1 %v1100_v62 }
  0xee   :  { %1102 = vmatprep.subr.bf16.mxu1 %v1141_v17 }
  0xf1   :  { %1104 = vmatpush3.bf16.msra.mxu1 %v1103_v4 }
  0xf2   :  { %1126 = vmatprep.subr.bf16.mxu1 %v1141_v17 }
 0x1b3   :  { %v990_v33 = vpop.f32.mrb[2].mxu1 }
 0x1b4   :  { %v410_v34 = vmul.f32 %v990_v33, %v36_v31  ;;  %v400_v35 = vpop.f32.mrb[3].mxu1 }
 0x1b5   :  { %v409_v36 = vmul.f32 %v400_v35, %v35_v32 }
 0x1b7   :  { %v1088_v38 = vpack.c.bf16 %v410_v34, %v409_v36 }
 0x1b9   :  { %1089 = vmatpush3.bf16.msra.mxu0 %v1088_v38  ;;  %v55_v38 = vld [vmem:[%s1385_s3 + $0x108] sm:$0xff] }
 0x1ba   :  { %1107 = vmatprep.subr.msk.bf16.mxu0 %vm1195_vm3, %v1105_v45 }
 0x1bc   :  { %996 = vmatmul.mubr.msk.f32.vlgmr.msra.gmra.mrb[4].mxu0 %vm73_vm0, %v144_v39 }
 0x1bd   :  { %1110 = vmatpush3.bf16.msk.msra.mxu0 %vm1195_vm3, %v1105_v45  ;;  %1025 = vmatprep.mubr.msk.f32.mxu0 %vm323_vm5, %v59_v58  ;;  %v57_v45 = vld [vmem:[%s1385_s3 + $0x118] sm:$0xff] }
 0x1be   :  { %1111 = vmatprep.subr.bf16.mxu0 %v1141_v17 }
 0x1c0   :  { %1026 = vmatmul.mubr.msk.f32.vlgmr.msra.gmra.mrb[6].mxu0 %vm323_vm5, %v60_v59  ;;  %v906_v59 = vld [vmem:[%s1385_s3 + $0x50] ss:$0 sm:$0xff] }
 0x1c1   :  { %1028 = vmatprep.mubr.msk.f32.mxu0 %vm323_vm5, %v61_v63 }
 0x1c4   :  { %1029 = vmatmul.mubr.msk.f32.gmra.mrb[8].mxu0 %vm323_vm5, %v62_v1 }
 0x1c5   :  { %1031 = vmatprep.mubr.msk.f32.mxu0 %vm323_vm5, %v63_v3 }
 0x1c8   :  { %1032 = vmatmul.mubr.msk.f32.gmra.mrb[10].mxu0 %vm323_vm5, %v64_v5 }
 0x1c9   :  { %1034 = vmatprep.mubr.msk.f32.mxu0 %vm323_vm5, %v65_v6 }
 0x1cc   :  { %1035 = vmatmul.mubr.msk.f32.gmra.mrb[12].mxu0 %vm323_vm5, %v66_v7 }
 0x1cd   :  { %1037 = vmatprep.mubr.msk.f32.mxu0 %vm323_vm5, %v67_v8 }
 0x1d0   :  { %1038 = vmatmul.mubr.msk.f32.gmra.mrb[14].mxu0 %vm323_vm5, %v68_v9 }
 0x1d1   :  { %1060 = vmatprep.mubr.msk.f32.mxu0 %vm1142_vm4, %v1143_v18 }
 0x28f   :  { %v480_v49 = vpop.f32.mrb[4].mxu0 }
 0x290   :  { %v997_v50 = vpop.f32.mrb[5].mxu0  ;;  %v485_v51 = vsel %vm484_vm6, %v480_v49, -inf }
 0x291   :  { %486 = vmax.xlane.f32.xlu1 %v485_v51  ;;  %v28_v50 = vld [vmem:[%s1385_s3 + $0x30] sm:$0xff]  ;;  %v29_v51 = vld [vmem:[%s1385_s3 + $0x38] sm:$0xff] }
 0x292   :  { %v1127_v52 = vpack.c.bf16 %v29_v51, %v28_v50 }
 0x293   :  { %v1027_v16 = vpop.f32.mrb[6].mxu0 }
 0x294   :  { %v717_v19 = vmul.f32 %v1027_v16, %v50_v14  ;;  %v667_v20 = vpop.f32.mrb[7].mxu0 }
 0x295   :  { %v716_v21 = vmul.f32 %v667_v20, %v49_v15 }
 0x297   :  { %v1112_v23 = vpack.c.bf16 %v717_v19, %v716_v21  ;;  %v1030_v24 = vpop.f32.mrb[8].mxu0 }
 0x298   :  { %v719_v25 = vmul.f32 %v1030_v24, %v52_v22  ;;  %v677_v26 = vpop.f32.mrb[9].mxu0 }
 0x299   :  { %1113 = vmatpush3.bf16.msra.mxu0 %v1112_v23 }
 0x29a   :  { %1114 = vmatprep.subr.bf16.mxu0 %v1141_v17 }
 0x29b   :  { %v1033_v31 = vpop.f32.mrb[10].mxu0 }
 0x29c   :  { %v721_v32 = vmul.f32 %v1033_v31, %v54_v28  ;;  %v687_v33 = vpop.f32.mrb[11].mxu0 }
 0x29d   :  { %v720_v34 = vmul.f32 %v687_v33, %v53_v29 }
 0x29f   :  { %v1118_v35 = vpack.c.bf16 %v721_v32, %v720_v34  ;;  %v1036_v36 = vpop.f32.mrb[12].mxu0 }
 0x2a0   :  { %v697_v39 = vpop.f32.mrb[13].mxu0  ;;  %v723_v40 = vmul.f32 %v1036_v36, %v56_v37 }
 0x2a1   :  { %v722_v41 = vmul.f32 %v697_v39, %v55_v38 }
 0x2a3   :  { %v1121_v42 = vpack.c.bf16 %v723_v40, %v722_v41  ;;  %v1039_v43 = vpop.f32.mrb[14].mxu0 }
 0x2a4   :  { %v707_v46 = vpop.f32.mrb[15].mxu0  ;;  %v725_v47 = vmul.f32 %v1039_v43, %v58_v44 }
 0x2a5   :  { %v724_v48 = vmul.f32 %v707_v46, %v57_v45 }
 0x31e   :  { %v487_v10 = vpop.xlane.xlu1 %486 }
 0x31f   :  { %v488_v11 = vsub.f32 %v480_v49, %v487_v10  ;;  %v1124_v49 = vpack.c.bf16 %v725_v47, %v724_v48 }
 0x321   :  { %v489_v12 = vmul.f32 1.442695, %v488_v11 }
 0x323   :  { %1135 = vpow2.f32 %v489_v12 }
 0x32d   :  { %v1136_v13 = vpop.eup %1135 }
 0x32e   :  { %1019 = vmatmul.mubr.msk.f32.vlgmr.msra.gmra.mrb[4].mxu1 %vm491_vm7, %v1136_v13 }
 0x32f   :  { %1067 = vmatprep.mubr.msk.f32.mxu1 %vm1142_vm4, %v1143_v18  ;;  %v51_v18 = vld [vmem:[%s1385_s3 + $0xe8] sm:$0xff]  ;;  %1128 = vmatpush3.bf16.msra.mxu1 %v1127_v52 }
 0x330   :  { %v718_v27 = vmul.f32 %v677_v26, %v51_v18 }
 0x332   :  { %v1115_v30 = vpack.c.bf16 %v719_v25, %v718_v27 }
 0x334   :  { %1116 = vmatpush3.bf16.msra.mxu0 %v1115_v30 }
 0x335   :  { %1117 = vmatprep.subr.bf16.mxu0 %v1141_v17 }
 0x338   :  { %1119 = vmatpush3.bf16.msra.mxu0 %v1118_v35 }
 0x339   :  { %1120 = vmatprep.subr.bf16.mxu0 %v1141_v17 }
 0x33c   :  { %1122 = vmatpush3.bf16.msra.mxu0 %v1121_v42 }
 0x33d   :  { %1123 = vmatprep.subr.bf16.mxu0 %v1141_v17 }
 0x340   :  { %1125 = vmatpush3.bf16.msra.mxu0 %v1124_v49 }
 0x401   :  { %v561_v53 = vpop.f32.mrb[4].mxu1 }
 0x402   :  { %v565_v54 = vmax.f32 %v561_v53, 1e-30  ;;  %v1020_v55 = vpop.f32.mrb[5].mxu1 }
 0x404   :  { %1137 = vrcp.f32 %v565_v54 }
 0x40e   :  { %v1138_v56 = vpop.eup %1137 }
 0x40f   :  { %v567_v57 = vmul.f32 %v1138_v56, %v1136_v13 }
 0x411   :  { %1061 = vmatmul.mubr.msk.f32.vlgmr.msra.gmra.mrb[16].mxu0 %vm491_vm7, %v567_v57 }
 0x4e4   :  { %v795_v17 = vpop.f32.mrb[16].mxu0 }
 0x4e5   :  { %v1062_v58 = vpop.f32.mrb[17].mxu0  ;;  %1068 = vmatmul.mubr.msk.f32.vlgmr.msra.gmra.mrb[6].mxu1 %vm73_vm0, %v795_v17 }
 0x5b8   :  { %v872_v60 = vpop.f32.mrb[6].mxu1 }
 0x5b9   :  { %v873_v61 = vadd.f32 %v906_v59, %v872_v60  ;;  %v1069_v62 = vpop.f32.mrb[7].mxu1 }
 0x5bb   :  { %877 = vst.msk [vmem:[%s1388_s4] sm:$0x1f] %vm876_vm8, %v873_v61 }

</bundles_post_ra>
